<compile_context>
chip_gen: v7x
topology: tpu7x:2x2x1
jax: 0.10.0
libtpu: 0.0.40
codegen_flags: <defaults>
</compile_context>

<pallas_src>
import jax
import jax.numpy as jnp
from jax.experimental import pallas as pl
from jax.experimental.pallas import tpu as pltpu


def _fill_kernel(emb_ref, out_ref):
    # emb_ref: (1, tn)  lane-dense slice of the transposed embedding table.
    # out_ref: (tb, tn) output tile (tb batch rows, same tn lane window).
    out_ref[...] = jnp.broadcast_to(emb_ref[...], out_ref.shape)


def _tpu_budget():
    """Return (vmem_capacity_bytes, multi_core) with conservative fallbacks."""
    vmem_cap = 64 * 1024 * 1024  # conservative default (v7x-class per-core VMEM)
    num_cores = None
    try:
        info = pltpu.get_tpu_info()
        cap = getattr(info, "vmem_capacity_bytes", None)
        if cap:
            vmem_cap = int(cap)
        for name in ("num_cores", "tensorcores_per_chip", "cores_per_chip"):
            v = getattr(info, name, None)
            if v:
                num_cores = int(v)
                break
    except Exception:
        pass
    multi_core = (num_cores or 0) > 1 or vmem_cap < 100 * 1024 * 1024
    return vmem_cap, multi_core


def _pick_lane_tile(cn, max_elems):
    """Lane-axis tile: full extent if it fits, else a multiple of 128
    (preferring a divisor of cn so the final block is not masked)."""
    if cn <= max_elems:
        return cn
    cap = max(128, (max_elems // 128) * 128)
    t = cap
    while t >= 128:
        if cn % t == 0:
            return t
        t -= 128
    return cap  # ragged final tile; Pallas masks the partial store


def _table_spec(tn, index_map, single_buffer):
    if single_buffer:
        try:
            return pl.BlockSpec((1, tn), index_map, pipeline_mode=pl.Buffered(1))
        except (TypeError, AttributeError):
            pass  # older API without pipeline_mode / Buffered: default buffering
    return pl.BlockSpec((1, tn), index_map)


def channel_positional_embedding(x: jax.Array, embedding: jax.Array) -> jax.Array:
    """x: only x.shape[0] (batch) is used.  embedding: (length, channels).
    Returns (batch, channels, length) with out[b, c, n] == embedding[n, c]."""
    batch = x.shape[0]
    length, channels = embedding.shape
    dtype = embedding.dtype
    itemsize = jnp.dtype(dtype).itemsize
    cn = channels * length

    vmem_cap, multi_core = _tpu_budget()
    big_vmem = vmem_cap >= 100 * 1024 * 1024          # v5e / v6e: 128 MiB VMEM
    target_block_bytes = (8 if big_vmem else 4) * 1024 * 1024

    # Lane-dense table: (length, channels) -> (channels, length) -> (1, C*N).
    emb_flat = jnp.transpose(embedding, (1, 0)).reshape(1, cn)

    # ---- tile selection ----------------------------------------------------
    def pad8(v):  # sublane padding for VMEM sizing
        return ((v + 7) // 8) * 8

    # Batch rows per block: whole batch unless that alone busts the budget
    # (then a multiple of 8 to satisfy the (8, 128) block rule).
    if pad8(batch) * 128 * itemsize <= target_block_bytes:
        tb = batch
    else:
        tb = min(batch, max(8, (target_block_bytes // (128 * itemsize) // 8) * 8))
    nb = pl.cdiv(batch, tb)

    # Lane tile within the per-block byte budget (accounting for sublane pad).
    max_tn = max(128, target_block_bytes // (pad8(tb) * itemsize))
    tn = _pick_lane_tile(cn, max_tn)
    n_tiles = pl.cdiv(cn, tn)

    # v7x-class (2 TensorCores): make sure the parallel grid has >= 2 tiles.
    if multi_core and n_tiles * nb == 1 and cn >= 256:
        tn = min(cn, ((pl.cdiv(cn, 2) + 127) // 128) * 128)
        n_tiles = pl.cdiv(cn, tn)

    # ---- VMEM budget (worst-case sublane padding) ---------------------------
    out_block_vmem = pad8(tb) * tn * itemsize
    tbl_block_vmem = 8 * tn * itemsize
    tbl_bufs = 1 if n_tiles == 1 else 2
    vmem_limit = 2 * out_block_vmem + tbl_bufs * tbl_block_vmem + (2 << 20)
    vmem_limit = max(vmem_limit, 16 << 20)
    vmem_limit = min(int(vmem_limit), max(16 << 20, int(vmem_cap * 0.9)))

    # Pure memory-bound op: batch*C*N written once, table read once.
    bytes_accessed = batch * cn * itemsize + cn * itemsize

    grid_spec = pltpu.PrefetchScalarGridSpec(
        num_scalar_prefetch=0,
        # Lane-tile axis OUTER: each table slice is fetched from HBM once and
        # reused for every batch tile of the inner axis.
        grid=(n_tiles, nb),
        in_specs=[
            _table_spec(tn, lambda n, b: (0, n), single_buffer=(n_tiles == 1))
        ],
        out_specs=pl.BlockSpec((tb, tn), lambda n, b: (b, n)),
    )

    out_flat = pl.pallas_call(
        _fill_kernel,
        out_shape=jax.ShapeDtypeStruct((batch, cn), dtype),
        grid_spec=grid_spec,
        compiler_params=pltpu.CompilerParams(
            dimension_semantics=("parallel", "parallel"),
            vmem_limit_bytes=int(vmem_limit),
        ),
        cost_estimate=pl.CostEstimate(
            flops=0, transcendentals=0, bytes_accessed=int(bytes_accessed)
        ),
    )(emb_flat)

    # Free reshape: row-major (b, c*length + n) == row-major (b, c, n).
    return out_flat.reshape(batch, channels, length)


if __name__ == "__main__":
    key = jax.random.PRNGKey(0)
    k_emb, k_x, k_emb2, k_x2 = jax.random.split(key, 4)

    # Small shapes consistent with the module.
    batch, channels, length = 2, 8, 16
    # nn.Embedding default init: N(0, 1)
    embedding = jax.random.normal(k_emb, (length, channels), dtype=jnp.float32)
    # x is only used for its batch dimension in the forward pass.
    x = jax.random.normal(k_x, (batch, channels, length), dtype=jnp.float32)

    out = jax.block_until_ready(channel_positional_embedding(x, embedding))
    ref = jnp.broadcast_to(
        jnp.transpose(embedding, (1, 0))[None], (batch, channels, length)
    )
    assert out.shape == (batch, channels, length)
    assert out.dtype == embedding.dtype
    assert bool(jnp.array_equal(out, ref)), "mismatch vs reference"

    # Second tiny config (non-power-of-two batch) to exercise tile selection.
    batch2, channels2, length2 = 3, 4, 32
    embedding2 = jax.random.normal(k_emb2, (length2, channels2), dtype=jnp.float32)
    x2 = jax.random.normal(k_x2, (batch2, channels2, length2), dtype=jnp.float32)
    out2 = jax.block_until_ready(channel_positional_embedding(x2, embedding2))
    ref2 = jnp.broadcast_to(
        jnp.transpose(embedding2, (1, 0))[None], (batch2, channels2, length2)
    )
    assert bool(jnp.array_equal(out2, ref2)), "mismatch vs reference (cfg 2)"

    print("KERNEL_OK")
</pallas_src>

<mosaic_0001>
module attributes {stable_mosaic.version = 11 : i64} {
  func.func @_fill_kernel(%arg0: i32, %arg1: i32, %arg2: memref<1x128xf32, #tpu.memory_space<vmem>>, %arg3: memref<2x128xf32, #tpu.memory_space<vmem>>) attributes {dimension_semantics = [#tpu.dimension_semantics<parallel>, #tpu.dimension_semantics<parallel>], iteration_bounds = array<i64: 1, 1>, scalar_prefetch = 0 : i64, scratch_operands = 0 : i64, tpu.core_type = #tpu.core_type<tc>, window_params = [{pipeline_mode = #tpu.pipeline_mode<synchronous>, transform_indices = @transform_0, window_bounds = array<i64: 1, 128>}, {transform_indices = @transform_1, window_bounds = array<i64: 2, 128>}]} {
    %c0 = arith.constant 0 : index
    %c0_0 = arith.constant 0 : index
    %0 = vector.load %arg2[%c0, %c0_0] : memref<1x128xf32, #tpu.memory_space<vmem>>, vector<1x128xf32>
    %1 = vector.shape_cast %0 : vector<1x128xf32> to vector<1x128xf32>
    %2 = vector.broadcast %1 : vector<1x128xf32> to vector<2x128xf32>
    %c0_1 = arith.constant 0 : index
    %c0_2 = arith.constant 0 : index
    %3 = vector.load %arg3[%c0_1, %c0_2] : memref<2x128xf32, #tpu.memory_space<vmem>>, vector<2x128xf32>
    tpu.vector_store %arg3[%c0_1, %c0_2], %2 {strides = array<i32>} : memref<2x128xf32, #tpu.memory_space<vmem>>, vector<2x128xf32>,
    return
  }
  func.func @transform_0(%arg0: i32, %arg1: i32) -> (i32, i32) {
    %c0_i32 = arith.constant 0 : i32
    %c0_i32_0 = arith.constant 0 : i32
    return %c0_i32, %arg0 : i32, i32
  }
  func.func @transform_1(%arg0: i32, %arg1: i32) -> (i32, i32) {
    %c0_i32 = arith.constant 0 : i32
    return %arg1, %arg0 : i32, i32
  }
}

</mosaic_0001>

<bundles_post_ra>
// kernel: tpu_custom_call.1
= control target key start
LH: loop header
LB: loop body
LE: loop exit
PB: predicated region body
PF: predicated region fallthrough
CT: control target
= control target key end

     0   :  { %6 = vsyncpa [#allocation3], 0  ;;  %s131_s0 = inlined_call_operand.hbm [shape: f32[1,128], index: 0, kind: input, shape index: {}]   ;;  %s132_s1 = inlined_call_operand.hbm [shape: f32[2,128], index: 1, kind: output, shape index: {}]  }
   0x1   :  { %7 = vsyncpa [#allocation4], 0  ;;  %s95_s6 = smov [#allocation2]   ;;  %s47_s10 = scalar_lea.hbm %s131_s0, 16 }
   0x2   :  { %s14_s7 = sshll.u32 %s95_s6, 4  ;;  %p48_p0 = scmp.ne.s32.totalorder %s131_s0, %s47_s10  ;;  %s15_s7 = int_to_ptr.vmem [resolvable:$true] %s14_s7 }
   0x3   :  { %p51_p1 = scmp.lt.u32.totalorder %s47_s10, %s131_s0 }
   0x5   :  { %p53_p2 = pnand %p51_p1, %p48_p0 }
   0x7   :  { %56 = shalt.err (!%p53_p2)
}
   0x8   :  { %s57_s15 = scalar_lea.vmem %s15_s7, 16  ;;  %s61_s16 = scalar_lea.vmem %s15_s7, 32 }
   0x9   :  { %p58_p3 = scmp.ne.s32.totalorder %s15_s7, %s57_s15  ;;  %p62_p4 = scmp.lt.s32.totalorder %s15_s7, %s15_s7 }
   0xa   :  { %p63_p5 = scmp.lt.s32.totalorder %s61_s16, %s57_s15 }
   0xc   :  { %p64_p6 = por %p63_p5, %p62_p4 }
   0xe   :  { %p65_p7 = pnand %p64_p6, %p58_p3 }
  0x10   :  { %68 = shalt.err (!%p65_p7)
}
  0x11   :  { %17 = dma.hbm_to_vmem [thread:$0]  %s131_s0, 16, %s15_s7, [#allocation3]  }
  0x12   :  { %91 = dma.done.wait [#allocation3], 16  }
  0x13   :  { %92 = vsyncadd [#allocation3], 4294967280  ;;  %s96_s19 = smov [#allocation5]   ;;  %v44_v0 = vld [vmem:[#allocation2] ss:$0 sm:$0xff] }
  0x14   :  { %s35_s20 = sshll.u32 %s96_s19, 4  ;;  %28 = vst [vmem:[#allocation5] sm:$0x3] %v44_v0  ;;  %s36_s20 = int_to_ptr.vmem [resolvable:$true] %s35_s20 }
  0x15   :  { %s69_s21 = scalar_lea.vmem %s36_s20, 32  ;;  %p74_p9 = scmp.lt.s32.totalorder %s36_s20, %s36_s20 }
  0x16   :  { %p70_p8 = scmp.ne.s32.totalorder %s36_s20, %s69_s21  ;;  %p75_p10 = scmp.lt.s32.totalorder %s69_s21, %s69_s21 }
  0x18   :  { %p76_p11 = por %p75_p10, %p74_p9 }
  0x1a   :  { %p77_p12 = pnand %p76_p11, %p70_p8 }
  0x1c   :  { %80 = shalt.err (!%p77_p12)
}
  0x1d   :  { %s81_s24 = scalar_lea.hbm %s132_s1, 32 }
  0x1e   :  { %p82_p13 = scmp.ne.s32.totalorder %s132_s1, %s81_s24  ;;  %p85_p0 = scmp.lt.u32.totalorder %s81_s24, %s132_s1 }
  0x20   :  { %p87_p1 = pnand %p85_p0, %p82_p13 }
  0x22   :  { %90 = shalt.err (!%p87_p1)
}
  0x23   :  { %38 = dma.vmem_to_hbm [thread:$0]  %s36_s20, 32, %s132_s1, [#allocation4]  }
  0x24   :  { %93 = dma.done.wait [#allocation4], 32  }
  0x25   :  { %94 = vsyncadd [#allocation4], 4294967264 }
  0x26   :  { %42 = vsyncpa [#allocation3], 1 }
  0x27   :  { %43 = vsyncpa [#allocation4], 1 }

</bundles_post_ra>
